<compile_context>
chip_gen: v5e
topology: v5e:2x2
jax: 0.10.0
libtpu: 0.0.40
codegen_flags: <defaults>
</compile_context>

<pallas_src>
import functools

import jax
import jax.numpy as jnp
from jax.experimental import pallas as pl
from jax.experimental.pallas import tpu as pltpu


def cma_kernel(x_ref, pool_ref, eh_ref, ew_ref, w1_ref, w2_ref, w3_ref,
               bias_ref, o_ref, *, h, mip_rows, oup_rows):
    # x_ref block: (BT*C, H*W), lane-dense (H*W on the lane axis).
    x = x_ref[...]                                                     # (R, HW)
    bias = bias_ref[...]                                               # (Rmax, 3)

    # Both adaptive average pools in one MXU pass:
    #   strip[:, :H] = mean over W  (== pool_h),  strip[:, H:] = mean over H (== pool_w)
    strip = jnp.dot(x, pool_ref[...],
                    preferred_element_type=jnp.float32)                # (R, H+W)

    # conv1 (1x1) + folded BN + ReLU; block-diagonal over the batch tile
    # -> a single matmul for all images in the tile.
    y = jnp.dot(w1_ref[...], strip, preferred_element_type=jnp.float32)
    y = jnp.maximum(y + bias[:mip_rows, 0:1], 0.0)                     # (BT*MIP, H+W)

    y_h = y[:, :h]                                                     # (BT*MIP, H)
    y_w = y[:, h:]                                                     # (BT*MIP, W)

    # conv2 / conv3 (1x1) + sigmoid -> per-row / per-column attention.
    a_h = jax.nn.sigmoid(
        jnp.dot(w2_ref[...], y_h, preferred_element_type=jnp.float32)
        + bias[:oup_rows, 1:2])                                        # (BT*OUP, H)
    a_w = jax.nn.sigmoid(
        jnp.dot(w3_ref[...], y_w, preferred_element_type=jnp.float32)
        + bias[:oup_rows, 2:3])                                        # (BT*OUP, W)

    # Expand the attention back onto the lane-dense H*W axis via one-hot
    # expansion matmuls (exact: one nonzero per output element), then apply.
    attn = (jnp.dot(a_h, eh_ref[...], preferred_element_type=jnp.float32)
            * jnp.dot(a_w, ew_ref[...], preferred_element_type=jnp.float32))
    o_ref[...] = x * attn                                              # (R, HW)


def _pick_batch_tile(n, c, hw, budget_bytes=8 << 20):
    """Largest batch tile whose x/out block fits the per-block VMEM budget
    while keeping the block's sublane dim (bt*c) layout-friendly."""
    per_image = c * hw * 4
    fallback = n
    for bt in range(n, 0, -1):
        if n % bt:
            continue
        ok_layout = (bt == n) or ((bt * c) % 8 == 0)
        if not ok_layout:
            continue
        if bt * per_image <= budget_bytes:
            return bt
        fallback = bt
    return fallback


def cma_variant_pallas(x, params):
    """x: (N, C, H, W) float32. params: raw (unfolded) CMA_variant weights."""
    n, c, h, w = x.shape
    hw = h * w
    mip = params["w1"].shape[0]
    oup = params["w2"].shape[0]
    assert oup == c, "output channels must equal input channels for final product"

    # ---- fold BatchNorm2d (eval) into conv1 ----
    scale = params["gamma"] / jnp.sqrt(params["var"] + params["eps"])   # (mip,)
    shift = params["beta"] - params["mean"] * scale                     # (mip,)
    w1f = params["w1"] * scale[:, None]                                 # (mip, c)
    b1f = params["b1"] * scale + shift                                  # (mip,)

    # ---- batch tile (whole batch at small sizes) ----
    bt = _pick_batch_tile(n, c, hw)
    block_rows = bt * c

    # ---- block-diagonal weights: one MXU push per 1x1 conv per batch tile ----
    eye = jnp.eye(bt, dtype=jnp.float32)
    w1bd = jnp.kron(eye, w1f)                                           # (bt*mip, bt*c)
    w2bd = jnp.kron(eye, params["w2"])                                  # (bt*oup, bt*mip)
    w3bd = jnp.kron(eye, params["w3"])                                  # (bt*oup, bt*mip)

    r1, r23 = bt * mip, bt * oup
    rmax = max(r1, r23)
    bias = jnp.zeros((rmax, 3), jnp.float32)
    bias = bias.at[:r1, 0].set(jnp.tile(b1f, bt))
    bias = bias.at[:r23, 1].set(jnp.tile(params["b2"], bt))
    bias = bias.at[:r23, 2].set(jnp.tile(params["b3"], bt))

    # ---- constant pooling / expansion matrices (flattened row-major H*W) ----
    lidx = jnp.arange(hw)
    hh = lidx // w
    ww = lidx % w
    pool_mat = jnp.concatenate(
        [(hh[:, None] == jnp.arange(h)[None, :]).astype(jnp.float32) / w,   # mean over W
         (ww[:, None] == jnp.arange(w)[None, :]).astype(jnp.float32) / h],  # mean over H
        axis=1)                                                              # (HW, H+W)
    eh = (jnp.arange(h)[:, None] == hh[None, :]).astype(jnp.float32)         # (H, HW)
    ew = (jnp.arange(w)[:, None] == ww[None, :]).astype(jnp.float32)         # (W, HW)

    # ---- lane-dense activation layout ----
    x2d = x.reshape(n * c, hw)

    # ---- explicit VMEM budget: 2x(in)+2x(out) blocks + operands + headroom ----
    block_bytes = block_rows * hw * 4
    aux_bytes = sum(int(a.size) * 4 for a in
                    (pool_mat, eh, ew, w1bd, w2bd, w3bd, bias))
    vmem_limit = int(min(128 << 20, max(16 << 20,
                                        4 * block_bytes + 2 * aux_bytes + (8 << 20))))

    kernel = functools.partial(cma_kernel, h=h, mip_rows=r1, oup_rows=r23)
    full2d = lambda arr: pl.BlockSpec(arr.shape, lambda i: (0, 0))

    out2d = pl.pallas_call(
        kernel,
        out_shape=jax.ShapeDtypeStruct((n * c, hw), jnp.float32),
        grid=(n // bt,),
        in_specs=[
            pl.BlockSpec((block_rows, hw), lambda i: (i, 0)),   # x (lane-dense)
            full2d(pool_mat), full2d(eh), full2d(ew),
            full2d(w1bd), full2d(w2bd), full2d(w3bd), full2d(bias),
        ],
        out_specs=pl.BlockSpec((block_rows, hw), lambda i: (i, 0)),
        compiler_params=pltpu.CompilerParams(
            dimension_semantics=("parallel",),
            vmem_limit_bytes=vmem_limit),
    )(x2d, pool_mat, eh, ew, w1bd, w2bd, w3bd, bias)

    return out2d.reshape(n, c, h, w)


def cma_variant_reference(x, params):
    """Pure-JAX reference mirroring the PyTorch forward (BN in eval mode)."""
    n, c, h, w = x.shape
    x_h = jnp.mean(x, axis=3)                                   # (N, C, H)
    x_w = jnp.mean(x, axis=2)                                   # (N, C, W)
    y = jnp.concatenate([x_h, x_w], axis=2)                     # (N, C, H+W)
    y = jnp.einsum("mc,ncl->nml", params["w1"], y) + params["b1"][None, :, None]
    scale = params["gamma"] / jnp.sqrt(params["var"] + params["eps"])
    shift = params["beta"] - params["mean"] * scale
    y = jnp.maximum(y * scale[None, :, None] + shift[None, :, None], 0.0)
    y_h, y_w = y[:, :, :h], y[:, :, h:]
    a_h = jax.nn.sigmoid(jnp.einsum("om,nmh->noh", params["w2"], y_h)
                         + params["b2"][None, :, None])
    a_w = jax.nn.sigmoid(jnp.einsum("om,nmw->now", params["w3"], y_w)
                         + params["b3"][None, :, None])
    return x * a_h[:, :, :, None] * a_w[:, :, None, :]


def make_params(key, inp, oup, reduction=1):
    mip = max(8, inp // reduction)
    ks = jax.random.split(key, 10)
    return dict(
        w1=jax.random.normal(ks[0], (mip, inp), jnp.float32) * 0.2,
        b1=jax.random.normal(ks[1], (mip,), jnp.float32) * 0.1,
        w2=jax.random.normal(ks[2], (oup, mip), jnp.float32) * 0.2,
        b2=jax.random.normal(ks[3], (oup,), jnp.float32) * 0.1,
        w3=jax.random.normal(ks[4], (oup, mip), jnp.float32) * 0.2,
        b3=jax.random.normal(ks[5], (oup,), jnp.float32) * 0.1,
        gamma=1.0 + 0.1 * jax.random.normal(ks[6], (mip,), jnp.float32),
        beta=0.1 * jax.random.normal(ks[7], (mip,), jnp.float32),
        mean=0.1 * jax.random.normal(ks[8], (mip,), jnp.float32),
        var=jnp.abs(1.0 + 0.1 * jax.random.normal(ks[9], (mip,), jnp.float32)),
        eps=1e-5,
    )


if __name__ == "__main__":
    key = jax.random.PRNGKey(0)
    kx, kp = jax.random.split(key)

    N, C, H, W = 2, 4, 16, 16          # inp = oup = 4, reduction = 1 -> mip = 8
    x = jax.random.normal(kx, (N, C, H, W), jnp.float32)
    params = make_params(kp, inp=C, oup=C, reduction=1)

    out = jax.block_until_ready(cma_variant_pallas(x, params))
    ref = cma_variant_reference(x, params)

    assert out.shape == (N, C, H, W)
    err = float(jnp.max(jnp.abs(out - ref)))
    assert jnp.allclose(out, ref, atol=1e-4, rtol=1e-4), f"mismatch vs reference, max abs err={err}"

    print("KERNEL_OK")
</pallas_src>

<mosaic_0001>
module attributes {stable_mosaic.version = 11 : i64} {
  func.func @cma_kernel(%arg0: i32, %arg1: memref<8x256xf32, #tpu.memory_space<vmem>>, %arg2: memref<256x32xf32, #tpu.memory_space<vmem>>, %arg3: memref<16x256xf32, #tpu.memory_space<vmem>>, %arg4: memref<16x256xf32, #tpu.memory_space<vmem>>, %arg5: memref<16x8xf32, #tpu.memory_space<vmem>>, %arg6: memref<8x16xf32, #tpu.memory_space<vmem>>, %arg7: memref<8x16xf32, #tpu.memory_space<vmem>>, %arg8: memref<16x3xf32, #tpu.memory_space<vmem>>, %arg9: memref<8x256xf32, #tpu.memory_space<vmem>>) attributes {dimension_semantics = [#tpu.dimension_semantics<parallel>], iteration_bounds = array<i64: 1>, scalar_prefetch = 0 : i64, scratch_operands = 0 : i64, tpu.core_type = #tpu.core_type<tc>, window_params = [{transform_indices = @transform_0, window_bounds = array<i64: 8, 256>}, {pipeline_mode = #tpu.pipeline_mode<synchronous>, transform_indices = @transform_1, window_bounds = array<i64: 256, 32>}, {pipeline_mode = #tpu.pipeline_mode<synchronous>, transform_indices = @transform_2, window_bounds = array<i64: 16, 256>}, {pipeline_mode = #tpu.pipeline_mode<synchronous>, transform_indices = @transform_3, window_bounds = array<i64: 16, 256>}, {pipeline_mode = #tpu.pipeline_mode<synchronous>, transform_indices = @transform_4, window_bounds = array<i64: 16, 8>}, {pipeline_mode = #tpu.pipeline_mode<synchronous>, transform_indices = @transform_5, window_bounds = array<i64: 8, 16>}, {pipeline_mode = #tpu.pipeline_mode<synchronous>, transform_indices = @transform_6, window_bounds = array<i64: 8, 16>}, {pipeline_mode = #tpu.pipeline_mode<synchronous>, transform_indices = @transform_7, window_bounds = array<i64: 16, 3>}, {transform_indices = @transform_8, window_bounds = array<i64: 8, 256>}]} {
    %c0 = arith.constant 0 : index
    %c0_0 = arith.constant 0 : index
    %0 = vector.load %arg1[%c0, %c0_0] : memref<8x256xf32, #tpu.memory_space<vmem>>, vector<8x256xf32>
    %c0_1 = arith.constant 0 : index
    %c0_2 = arith.constant 0 : index
    %1 = vector.load %arg8[%c0_1, %c0_2] : memref<16x3xf32, #tpu.memory_space<vmem>>, vector<16x3xf32>
    %c0_3 = arith.constant 0 : index
    %c0_4 = arith.constant 0 : index
    %2 = vector.load %arg2[%c0_3, %c0_4] : memref<256x32xf32, #tpu.memory_space<vmem>>, vector<256x32xf32>
    %cst = arith.constant dense<0.000000e+00> : vector<8x32xf32>
    %3 = tpu.matmul %0, %2, %cst {dimension_numbers = #tpu.dot_dimension_numbers<[1], [0], [0], [1], [0, 0, 1, 1], [], []>} : vector<8x256xf32>, vector<256x32xf32>, vector<8x32xf32> -> vector<8x32xf32>
    %c0_5 = arith.constant 0 : index
    %c0_6 = arith.constant 0 : index
    %4 = vector.load %arg5[%c0_5, %c0_6] : memref<16x8xf32, #tpu.memory_space<vmem>>, vector<16x8xf32>
    %cst_7 = arith.constant dense<0.000000e+00> : vector<16x32xf32>
    %5 = tpu.matmul %4, %3, %cst_7 {dimension_numbers = #tpu.dot_dimension_numbers<[1], [0], [0], [1], [0, 0, 1, 1], [], []>} : vector<16x8xf32>, vector<8x32xf32>, vector<16x32xf32> -> vector<16x32xf32>
    %6 = vector.extract_strided_slice %1 {offsets = [0, 0], sizes = [16, 1], strides = [1, 1]} : vector<16x3xf32> to vector<16x1xf32>
    %7 = vector.broadcast %6 : vector<16x1xf32> to vector<16x32xf32>
    %8 = arith.addf %5, %7 : vector<16x32xf32>
    %cst_8 = arith.constant 0.000000e+00 : f32
    %9 = vector.broadcast %cst_8 : f32 to vector<16x32xf32>
    %10 = arith.maximumf %8, %9 : vector<16x32xf32>
    %11 = vector.extract_strided_slice %10 {offsets = [0, 0], sizes = [16, 16], strides = [1, 1]} : vector<16x32xf32> to vector<16x16xf32>
    %12 = vector.extract_strided_slice %10 {offsets = [0, 16], sizes = [16, 16], strides = [1, 1]} : vector<16x32xf32> to vector<16x16xf32>
    %c0_9 = arith.constant 0 : index
    %c0_10 = arith.constant 0 : index
    %13 = vector.load %arg6[%c0_9, %c0_10] : memref<8x16xf32, #tpu.memory_space<vmem>>, vector<8x16xf32>
    %cst_11 = arith.constant dense<0.000000e+00> : vector<8x16xf32>
    %14 = tpu.matmul %13, %11, %cst_11 {dimension_numbers = #tpu.dot_dimension_numbers<[1], [0], [0], [1], [0, 0, 1, 1], [], []>} : vector<8x16xf32>, vector<16x16xf32>, vector<8x16xf32> -> vector<8x16xf32>
    %15 = vector.extract_strided_slice %1 {offsets = [0, 1], sizes = [8, 1], strides = [1, 1]} : vector<16x3xf32> to vector<8x1xf32>
    %16 = vector.broadcast %15 : vector<8x1xf32> to vector<8x16xf32>
    %17 = arith.addf %14, %16 : vector<8x16xf32>
    %18 = arith.negf %17 : vector<8x16xf32>
    %19 = math.exp %18 : vector<8x16xf32>
    %cst_12 = arith.constant 1.000000e+00 : f32
    %20 = vector.broadcast %cst_12 : f32 to vector<8x16xf32>
    %21 = arith.addf %20, %19 : vector<8x16xf32>
    %22 = arith.divf %20, %21 : vector<8x16xf32>
    %c0_13 = arith.constant 0 : index
    %c0_14 = arith.constant 0 : index
    %23 = vector.load %arg7[%c0_13, %c0_14] : memref<8x16xf32, #tpu.memory_space<vmem>>, vector<8x16xf32>
    %cst_15 = arith.constant dense<0.000000e+00> : vector<8x16xf32>
    %24 = tpu.matmul %23, %12, %cst_15 {dimension_numbers = #tpu.dot_dimension_numbers<[1], [0], [0], [1], [0, 0, 1, 1], [], []>} : vector<8x16xf32>, vector<16x16xf32>, vector<8x16xf32> -> vector<8x16xf32>
    %25 = vector.extract_strided_slice %1 {offsets = [0, 2], sizes = [8, 1], strides = [1, 1]} : vector<16x3xf32> to vector<8x1xf32>
    %26 = vector.broadcast %25 : vector<8x1xf32> to vector<8x16xf32>
    %27 = arith.addf %24, %26 : vector<8x16xf32>
    %28 = arith.negf %27 : vector<8x16xf32>
    %29 = math.exp %28 : vector<8x16xf32>
    %cst_16 = arith.constant 1.000000e+00 : f32
    %30 = vector.broadcast %cst_16 : f32 to vector<8x16xf32>
    %31 = arith.addf %30, %29 : vector<8x16xf32>
    %32 = arith.divf %30, %31 : vector<8x16xf32>
    %c0_17 = arith.constant 0 : index
    %c0_18 = arith.constant 0 : index
    %33 = vector.load %arg3[%c0_17, %c0_18] : memref<16x256xf32, #tpu.memory_space<vmem>>, vector<16x256xf32>
    %cst_19 = arith.constant dense<0.000000e+00> : vector<8x256xf32>
    %34 = tpu.matmul %22, %33, %cst_19 {dimension_numbers = #tpu.dot_dimension_numbers<[1], [0], [0], [1], [0, 0, 1, 1], [], []>} : vector<8x16xf32>, vector<16x256xf32>, vector<8x256xf32> -> vector<8x256xf32>
    %c0_20 = arith.constant 0 : index
    %c0_21 = arith.constant 0 : index
    %35 = vector.load %arg4[%c0_20, %c0_21] : memref<16x256xf32, #tpu.memory_space<vmem>>, vector<16x256xf32>
    %cst_22 = arith.constant dense<0.000000e+00> : vector<8x256xf32>
    %36 = tpu.matmul %32, %35, %cst_22 {dimension_numbers = #tpu.dot_dimension_numbers<[1], [0], [0], [1], [0, 0, 1, 1], [], []>} : vector<8x16xf32>, vector<16x256xf32>, vector<8x256xf32> -> vector<8x256xf32>
    %37 = arith.mulf %34, %36 : vector<8x256xf32>
    %38 = arith.mulf %0, %37 : vector<8x256xf32>
    %c0_23 = arith.constant 0 : index
    %c0_24 = arith.constant 0 : index
    %39 = vector.load %arg9[%c0_23, %c0_24] : memref<8x256xf32, #tpu.memory_space<vmem>>, vector<8x256xf32>
    tpu.vector_store %arg9[%c0_23, %c0_24], %38 {strides = array<i32>} : memref<8x256xf32, #tpu.memory_space<vmem>>, vector<8x256xf32>,
    return
  }
  func.func @transform_0(%arg0: i32) -> (i32, i32) {
    %c0_i32 = arith.constant 0 : i32
    %c0_i32_0 = arith.constant 0 : i32
    return %arg0, %c0_i32 : i32, i32
  }
  func.func @transform_1(%arg0: i32) -> (i32, i32) {
    %c0_i32 = arith.constant 0 : i32
    %c0_i32_0 = arith.constant 0 : i32
    %c0_i32_1 = arith.constant 0 : i32
    return %c0_i32, %c0_i32_0 : i32, i32
  }
  func.func @transform_2(%arg0: i32) -> (i32, i32) {
    %c0_i32 = arith.constant 0 : i32
    %c0_i32_0 = arith.constant 0 : i32
    %c0_i32_1 = arith.constant 0 : i32
    return %c0_i32, %c0_i32_0 : i32, i32
  }
  func.func @transform_3(%arg0: i32) -> (i32, i32) {
    %c0_i32 = arith.constant 0 : i32
    %c0_i32_0 = arith.constant 0 : i32
    %c0_i32_1 = arith.constant 0 : i32
    return %c0_i32, %c0_i32_0 : i32, i32
  }
  func.func @transform_4(%arg0: i32) -> (i32, i32) {
    %c0_i32 = arith.constant 0 : i32
    %c0_i32_0 = arith.constant 0 : i32
    %c0_i32_1 = arith.constant 0 : i32
    return %c0_i32, %c0_i32_0 : i32, i32
  }
  func.func @transform_5(%arg0: i32) -> (i32, i32) {
    %c0_i32 = arith.constant 0 : i32
    %c0_i32_0 = arith.constant 0 : i32
    %c0_i32_1 = arith.constant 0 : i32
    return %c0_i32, %c0_i32_0 : i32, i32
  }
  func.func @transform_6(%arg0: i32) -> (i32, i32) {
    %c0_i32 = arith.constant 0 : i32
    %c0_i32_0 = arith.constant 0 : i32
    %c0_i32_1 = arith.constant 0 : i32
    return %c0_i32, %c0_i32_0 : i32, i32
  }
  func.func @transform_7(%arg0: i32) -> (i32, i32) {
    %c0_i32 = arith.constant 0 : i32
    %c0_i32_0 = arith.constant 0 : i32
    %c0_i32_1 = arith.constant 0 : i32
    return %c0_i32, %c0_i32_0 : i32, i32
  }
  func.func @transform_8(%arg0: i32) -> (i32, i32) {
    %c0_i32 = arith.constant 0 : i32
    %c0_i32_0 = arith.constant 0 : i32
    return %arg0, %c0_i32 : i32, i32
  }
}

</mosaic_0001>

<bundles_post_ra>
// kernel: tpu_custom_call.1
= control target key start
LH: loop header
LB: loop body
LE: loop exit
PB: predicated region body
PF: predicated region fallthrough
CT: control target
= control target key end

     0   :  { %s638_s0 = inlined_call_operand.vmem [shape: f32[8,256], index: 0, kind: input, shape index: {}]   ;;  %s639_s1 = inlined_call_operand.vmem [shape: f32[256,32], index: 1, kind: input, shape index: {}]   ;;  %s640_s2 = inlined_call_operand.vmem [shape: f32[16,256], index: 2, kind: input, shape index: {}]   ;;  %s641_s3 = inlined_call_operand.vmem [shape: f32[16,256], index: 3, kind: input, shape index: {}]   ;;  %s642_s4 = inlined_call_operand.vmem [shape: f32[16,8], index: 4, kind: input, shape index: {}]   ;;  %s643_s5 = inlined_call_operand.vmem [shape: f32[8,16], index: 5, kind: input, shape index: {}]   ;;  %s644_s6 = inlined_call_operand.vmem [shape: f32[8,16], index: 6, kind: input, shape index: {}]   ;;  %s645_s7 = inlined_call_operand.vmem [shape: f32[16,3], index: 7, kind: input, shape index: {}]   ;;  %s646_s8 = inlined_call_operand.hbm [shape: f32[8,256], index: 8, kind: output, shape index: {}]  }
   0x1   :  { %v49_v0 = vld [vmem:[%s639_s1 + $0x78] sm:$0xff]  ;;  %v48_v2 = vld [vmem:[%s639_s1 + $0x70] sm:$0xff]  ;;  %v47_v4 = vld [vmem:[%s639_s1 + $0x68] sm:$0xff] }
   0x2   :  { %v65_v1 = vld [vmem:[%s639_s1 + $0xf8] sm:$0xff]  ;;  %66 = vmatpush.msra.mxu0 %v49_v0  ;;  %v64_v3 = vld [vmem:[%s639_s1 + $0xf0] sm:$0xff]  ;;  %v63_v5 = vld [vmem:[%s639_s1 + $0xe8] sm:$0xff] }
   0x3   :  { %86 = vmatpush.msra.mxu1 %v65_v1  ;;  %v46_v6 = vld [vmem:[%s639_s1 + $0x60] sm:$0xff]  ;;  %v45_v8 = vld [vmem:[%s639_s1 + $0x58] sm:$0xff]  ;;  %v44_v10 = vld [vmem:[%s639_s1 + $0x50] sm:$0xff] }
   0x4   :  { %67 = vmatpush.msra.mxu0 %v48_v2  ;;  %v62_v7 = vld [vmem:[%s639_s1 + $0xe0] sm:$0xff]  ;;  %v61_v9 = vld [vmem:[%s639_s1 + $0xd8] sm:$0xff]  ;;  %v60_v11 = vld [vmem:[%s639_s1 + $0xd0] sm:$0xff] }
   0x5   :  { %87 = vmatpush.msra.mxu1 %v64_v3  ;;  %v43_v12 = vld [vmem:[%s639_s1 + $0x48] sm:$0xff] }
   0x6   :  { %68 = vmatpush.msra.mxu0 %v47_v4  ;;  %v59_v13 = vld [vmem:[%s639_s1 + $0xc8] sm:$0xff] }
   0x7   :  { %88 = vmatpush.msra.mxu1 %v63_v5 }
   0x8   :  { %69 = vmatpush.msra.mxu0 %v46_v6 }
   0x9   :  { %89 = vmatpush.msra.mxu1 %v62_v7 }
   0xa   :  { %70 = vmatpush.msra.mxu0 %v45_v8 }
   0xb   :  { %90 = vmatpush.msra.mxu1 %v61_v9 }
   0xc   :  { %71 = vmatpush.msra.mxu0 %v44_v10 }
   0xd   :  { %91 = vmatpush.msra.mxu1 %v60_v11 }
   0xe   :  { %13 = vsyncpa [#allocation3], 0  ;;  %v42_v14 = vld [vmem:[%s639_s1 + $0x40] sm:$0xff]  ;;  %72 = vmatpush.msra.mxu0 %v43_v12  ;;  %v41_v16 = vld [vmem:[%s639_s1 + $0x38] sm:$0xff]  ;;  %v427_v34 = vmov 0   ;;  %vm118_vm0 = vcmask 64512  }
   0xf   :  { %v58_v15 = vld [vmem:[%s639_s1 + $0xc0] sm:$0xff]  ;;  %92 = vmatpush.msra.mxu1 %v59_v13  ;;  %v57_v17 = vld [vmem:[%s639_s1 + $0xb8] sm:$0xff]  ;;  %v40_v18 = vld [vmem:[%s639_s1 + $0x30] sm:$0xff]  ;;  %384 = vset.pattern.permute.xlu0 %v427_v34  ;;  %vm155_vm1 = vcmask 130048   ;;  %s428_s14 = smov 112   ;;  %v429_v52 = vmov 1  }
  0x10   :  { %73 = vmatpush.msra.mxu0 %v42_v14  ;;  %v56_v19 = vld [vmem:[%s639_s1 + $0xb0] sm:$0xff]  ;;  %v39_v20 = vld [vmem:[%s639_s1 + $0x28] sm:$0xff]  ;;  %v38_v22 = vld [vmem:[%s639_s1 + $0x20] sm:$0xff]  ;;  %390 = vset.pattern.permute.xlu1 %v429_v52  ;;  %v430_v53 = vmov 2   ;;  %s360_s9 = sshll.u32 %s646_s8, 4  ;;  %s361_s9 = int_to_ptr.hbm [resolvable:$true] %s360_s9 }
  0x11   :  { %93 = vmatpush.msra.mxu1 %v58_v15  ;;  %v55_v21 = vld [vmem:[%s639_s1 + $0xa8] sm:$0xff]  ;;  %v54_v23 = vld [vmem:[%s639_s1 + $0xa0] sm:$0xff]  ;;  %v37_v24 = vld [vmem:[%s639_s1 + $0x18] sm:$0xff]  ;;  %391 = vset.pattern.permute.xlu2 %v430_v53 }
  0x12   :  { %74 = vmatpush.msra.mxu0 %v41_v16  ;;  %v53_v25 = vld [vmem:[%s639_s1 + $0x98] sm:$0xff]  ;;  %v36_v26 = vld [vmem:[%s639_s1 + $0x10] sm:$0xff]  ;;  %v35_v28 = vld [vmem:[%s639_s1 + $0x8] sm:$0xff] }
  0x13   :  { %94 = vmatpush.msra.mxu1 %v57_v17  ;;  %v52_v27 = vld [vmem:[%s639_s1 + $0x90] sm:$0xff]  ;;  %v51_v29 = vld [vmem:[%s639_s1 + $0x88] sm:$0xff]  ;;  %v34_v30 = vld [vmem:[%s639_s1] sm:$0xff] }
  0x14   :  { %75 = vmatpush.msra.mxu0 %v40_v18  ;;  %v50_v31 = vld [vmem:[%s639_s1 + $0x80] sm:$0xff]  ;;  %v581_v33 = vld [vmem:[%s638_s0 + $0x8] sm:$0xff]  ;;  %v255_v5 = vld [vmem:[%s640_s2 + $0x10] sm:$0xff] }
  0x15   :  { %95 = vmatpush.msra.mxu1 %v56_v19  ;;  %v576_v32 = vld [vmem:[%s638_s0] sm:$0xff]  ;;  %v33_v35 = vld [vmem:[%s645_s7 + $0x8] sm:$0xff]  ;;  %v256_v6 = vld [vmem:[%s640_s2 + $0x18] sm:$0xff] }
  0x16   :  { %76 = vmatpush.msra.mxu0 %v39_v20  ;;  %115 = vperm.xlu0 %384, %v33_v35   ;;  %v32_v36 = vld [vmem:[%s645_s7] sm:$0xff]  ;;  %v107_v41 = vld [vmem:[%s642_s4 + $0x8] sm:$0xff]  ;;  %v302_v14 = vld [vmem:[%s641_s3 + $0x10] sm:$0xff] }
  0x17   :  { %96 = vmatpush.msra.mxu1 %v55_v21  ;;  %v106_v40 = vld [vmem:[%s642_s4] sm:$0xff]  ;;  %200 = vperm.xlu2 %391, %v32_v36   ;;  %v254_v11 = vld [vmem:[%s640_s2 + $0x8] sm:$0xff]  ;;  %v303_v15 = vld [vmem:[%s641_s3 + $0x18] sm:$0xff] }
  0x18   :  { %77 = vmatpush.msra.mxu0 %v38_v22  ;;  %v150_v51 = vld [vmem:[%s643_s5] sm:$0xff]  ;;  %v301_v17 = vld [vmem:[%s641_s3 + $0x8] sm:$0xff] }
  0x19   :  { %97 = vmatpush.msra.mxu1 %v54_v23  ;;  %v198_v57 = vld [vmem:[%s644_s6] sm:$0xff] }
  0x1a   :  { %78 = vmatpush.msra.mxu0 %v37_v24  ;;  %v253_v10 = vld [vmem:[%s640_s2] sm:$0xff] }
  0x1b   :  { %98 = vmatpush.msra.mxu1 %v53_v25  ;;  %v300_v16 = vld [vmem:[%s641_s3] sm:$0xff]  ;;  %s431_s3 = smov [#allocation2]  }
  0x1c   :  { %79 = vmatpush.msra.mxu0 %v36_v26  ;;  %s358_s1 = sshll.u32 %s431_s3, 4  ;;  %s359_s1 = int_to_ptr.vmem [resolvable:$true] %s358_s1 }
  0x1d   :  { %99 = vmatpush.msra.mxu1 %v52_v27 }
  0x1e   :  { %80 = vmatpush.msra.mxu0 %v35_v28  ;;  %110 = vperm.xlu0 %384, %v32_v36  }
  0x1f   :  { %100 = vmatpush.msra.mxu1 %v51_v29 }
  0x20   :  { %81 = vmatpush.msra.mxu0 %v34_v30 }
  0x21   :  { %101 = vmatpush.msra.mxu1 %v50_v31  ;;  %82 = vmatmul.f32.vlgmr.msra.gmra.mxu0 %v576_v32 }
  0x22   :  { %102 = vmatmul.f32.vlgmr.msra.gmra.mxu1 %v581_v33 }
  0x26   :  { %392 = vset.pattern.permute.xlu0 %v430_v53 }
  0x71   :  { %v201_v18 = vpop.permute.xlu2 %200 }
  0x88   :  { %v116_v42 = vpop.permute.xlu0 %115 }
  0x90   :  { %v111_v44 = vpop.permute.xlu0 %110 }
  0x9e   :  { %v83_v37 = vpop.f32.mrf.mxu0 }
  0x9f   :  { %v103_v38 = vpop.f32.mrf.mxu1 }
  0xa0   :  { %v104_v39 = vadd.f32 %v103_v38, %v83_v37 }
  0xa2   :  { %140 = vmatpush.msra.mxu2 %v104_v39 }
  0xa3   :  { %369 = vmatmul.msk.f32.vlgmr.msra.gmra.mxu2 %vm118_vm0, %v106_v40 }
  0xa4   :  { %274 = vmatpush.msrb.mxu2 %v255_v5 }
  0xa6   :  { %275 = vmatpush.msrb.mxu2 %v253_v10 }
  0xa8   :  { %321 = vmatpush.msra.mxu2 %v302_v14 }
  0xaa   :  { %322 = vmatpush.msra.mxu2 %v300_v16 }
  0xab   :  { %370 = vmatmul.msk.f32.gmra.mxu2 %vm118_vm0, %v107_v41 }
 0x126   :  { %v142_v43 = vpop.f32.mrf.mxu2 }
 0x127   :  { %v143_v45 = vadd.f32 %v142_v43, %v111_v44 }
 0x129   :  { %v148_v48 = vmax.f32 %v143_v45, 0.0 }
 0x12e   :  { %v145_v46 = vpop.f32.mrf.mxu2 }
 0x12f   :  { %v146_v47 = vadd.f32 %v145_v46, %v116_v42 }
 0x131   :  { %v149_v49 = vmax.f32 %v146_v47, 0.0 }
 0x133   :  { %173 = vmatpush.msra.mxu3 %v149_v49  ;;  %v385_v50 = vpack.i.bf16 %v148_v48, %v149_v49 }
 0x135   :  { %386 = vrot.lane.b32.xlu1 %v385_v50, %s428_s14  ;;  %174 = vmatpush.msra.mxu3 %v148_v48 }
 0x136   :  { %371 = vmatmul.msk.f32.vlgmr.msra.gmra.mxu3 %vm155_vm1, %v150_v51 }
 0x13d   :  { %152 = vperm.xlu1 %390, %v32_v36  }
 0x1a7   :  { %v387_v54 = vpop.permute.xlu1 %386 }
 0x1a8   :  { %v388_v55 = vunpack.i.l.bf16 %v387_v54  ;;  %v389_v56 = vunpack.i.h.bf16 %v387_v54 }
 0x1aa   :  { %228 = vmatpush.msrb.mxu3 %v388_v55 }
 0x1ac   :  { %229 = vmatpush.msrb.mxu3 %v389_v56 }
 0x1ad   :  { %373 = vmatmul.msk.f32.vlgmr.msrb.gmra.mxu3 %vm155_vm1, %v198_v57 }
 0x1ae   :  { %294 = vmatpush.msra.mxu3 %v256_v6 }
 0x1af   :  { %v153_v59 = vpop.permute.xlu1 %152 }
 0x1b0   :  { %295 = vmatpush.msra.mxu3 %v254_v11 }
 0x1b2   :  { %341 = vmatpush.msrb.mxu3 %v303_v15 }
 0x1b4   :  { %342 = vmatpush.msrb.mxu3 %v301_v17 }
 0x1b9   :  { %v176_v58 = vpop.f32.mrf.mxu3 }
 0x1ba   :  { %v177_v60 = vadd.f32 %v176_v58, %v153_v59 }
 0x1bc   :  { %v372_v61 = vmul.f32 -1.442695, %v177_v60 }
 0x1be   :  { %393 = vpow2.f32 %v372_v61 }
 0x1c4   :  { %v394_v62 = vpop.eup %393 }
 0x1c5   :  { %v182_v63 = vadd.f32 1.0, %v394_v62 }
 0x1c7   :  { %395 = vrcp.f32 %v182_v63  ;;  %v194_v4 = vand.u32 2147483648, %v182_v63  ;;  %vm188_vm2 = vweird.f32 %v182_v63  ;;  %v192_v8 = vand.u32 2147483647, %v182_v63 }
 0x1c9   :  { %v195_v9 = vor.u32 1.1754944e-38, %v194_v4  ;;  %vm193_vm5 = vcmp.eq.f32.partialorder %v192_v8, 8.507059e+37 }
 0x1cd   :  { %v396_v0 = vpop.eup %395 }
 0x1ce   :  { %v184_v1 = vmul.f32 %v396_v0, %v182_v63  ;;  %vm189_vm3 = vweird.f32 %v396_v0 }
 0x1cf   :  { %vm190_vm4 = vmor %vm188_vm2, %vm189_vm3 }
 0x1d0   :  { %v185_v2 = vsub.f32 1.0, %v184_v1 }
 0x1d2   :  { %v186_v3 = vmul.f32 %v396_v0, %v185_v2 }
 0x1d4   :  { %v187_v7 = vadd.f32 %v396_v0, %v186_v3 }
 0x1d6   :  { %v191_v12 = vsel %vm190_vm4, %v396_v0, %v187_v7 }
 0x1d7   :  { %v196_v13 = vsel %vm193_vm5, %v195_v9, %v191_v12 }
 0x1d8   :  { %375 = vmatmul.msk.f32.vlgmr.msrb.gmra.mxu2 %vm155_vm1, %v196_v13  ;;  %376 = vmatmul.msk.f32.vlgmr.msra.gmra.mxu3 %vm155_vm1, %v196_v13 }
 0x230   :  { %v231_v19 = vpop.f32.mrf.mxu3 }
 0x231   :  { %v232_v20 = vadd.f32 %v231_v19, %v201_v18 }
 0x233   :  { %v374_v21 = vmul.f32 -1.442695, %v232_v20 }
 0x235   :  { %397 = vpow2.f32 %v374_v21 }
 0x23b   :  { %v398_v22 = vpop.eup %397 }
 0x23c   :  { %v237_v23 = vadd.f32 1.0, %v398_v22 }
 0x23e   :  { %399 = vrcp.f32 %v237_v23  ;;  %v249_v27 = vand.u32 2147483648, %v237_v23  ;;  %v247_v29 = vand.u32 2147483647, %v237_v23  ;;  %vm243_vm7 = vweird.f32 %v237_v23 }
 0x240   :  { %v250_v31 = vor.u32 1.1754944e-38, %v249_v27  ;;  %vm248_vm9 = vcmp.eq.f32.partialorder %v247_v29, 8.507059e+37 }
 0x244   :  { %v400_v24 = vpop.eup %399 }
 0x245   :  { %v239_v25 = vmul.f32 %v400_v24, %v237_v23  ;;  %vm244_vm6 = vweird.f32 %v400_v24 }
 0x246   :  { %vm245_vm8 = vmor %vm243_vm7, %vm244_vm6 }
 0x247   :  { %v240_v26 = vsub.f32 1.0, %v239_v25 }
 0x249   :  { %v241_v28 = vmul.f32 %v400_v24, %v240_v26 }
 0x24b   :  { %v242_v30 = vadd.f32 %v400_v24, %v241_v28 }
 0x24d   :  { %v246_v34 = vsel %vm245_vm8, %v400_v24, %v242_v30 }
 0x24e   :  { %v251_v35 = vsel %vm248_vm9, %v250_v31, %v246_v34 }
 0x24f   :  { %377 = vmatmul.msk.f32.vlgmr.msra.gmra.mxu2 %vm155_vm1, %v251_v35  ;;  %378 = vmatmul.msk.f32.vlgmr.msrb.gmra.mxu3 %vm155_vm1, %v251_v35 }
 0x25b   :  { %v277_v36 = vpop.f32.mrf.mxu2  ;;  %v297_v37 = vpop.f32.mrf.mxu3 }
 0x2d2   :  { %v324_v38 = vpop.f32.mrf.mxu2  ;;  %v344_v39 = vpop.f32.mrf.mxu3 }
 0x2d3   :  { %v347_v40 = vmul.f32 %v324_v38, %v277_v36  ;;  %v348_v41 = vmul.f32 %v344_v39, %v297_v37 }
 0x2d5   :  { %v349_v42 = vmul.f32 %v347_v40, %v576_v32  ;;  %v350_v43 = vmul.f32 %v348_v41, %v581_v33 }
 0x2d7   :  { %351 = vst [vmem:[#allocation2] sm:$0xff] %v349_v42 }
 0x2d8   :  { %352 = vst [vmem:[#allocation2 + $0x8] sm:$0xff] %v350_v43 }
 0x2d9   :  { %363 = dma.vmem_to_hbm [thread:$0]  %s359_s1, 256, %s361_s9, [#allocation3]  }
 0x2da   :  { %425 = dma.done.wait [#allocation3], 256  }
 0x2db   :  { %426 = vsyncadd [#allocation3], 4294967040 }
 0x2dc   :  { %368 = vsyncpa [#allocation3], 1 }

</bundles_post_ra>
